<compile_context>
chip_gen: v7x
topology: tpu7x:2x2x1
jax: 0.10.0
libtpu: 0.0.40
codegen_flags: <defaults>
</compile_context>

<pallas_src>
import functools

import jax
import jax.numpy as jnp
from jax.experimental import pallas as pl
from jax.experimental.pallas import tpu as pltpu


COMPUTE_DTYPE = jnp.bfloat16          # MXU operand dtype; accumulation is f32.
VMEM_LIMIT_BYTES = 32 * 1024 * 1024   # safe on v5e/v6e/v7x.


def _compiler_params():
    return pltpu.CompilerParams(
        dimension_semantics=("parallel",),   # grid over batch -> shards across TCs
        vmem_limit_bytes=VMEM_LIMIT_BYTES,
    )


# ----------------------------- Pallas kernels ------------------------------ #

def _conv3x3_kernel(x_ref, w_ref, b_ref, mask_ref, o_ref, *, H, Wp):
    """relu(conv3x3(x)*bn_scale + bn_bias) on padded-flat input/output.

    x_ref:    (1, Cin,  (H+3)*Wp)  padded-flat input (spatial on lanes)
    w_ref:    (9, Cout, Cin)       conv weight with BN scale folded, k = dy*3+dx
    b_ref:    (Cout, 1)            folded BN bias (f32)
    mask_ref: (1, H*Wp)            1.0 on valid columns, 0.0 on padded-width cols
    o_ref:    (1, Cout, (H+3)*Wp)  padded-flat output (zero ring written here)
    """
    L = H * Wp
    acc = jnp.dot(w_ref[0], x_ref[0, :, pl.ds(0, L)],
                  preferred_element_type=jnp.float32)
    for k in range(1, 9):
        dy, dx = divmod(k, 3)
        acc = acc + jnp.dot(w_ref[k], x_ref[0, :, pl.ds(dy * Wp + dx, L)],
                            preferred_element_type=jnp.float32)
    acc = jnp.maximum(acc + b_ref[...], 0.0) * mask_ref[...]
    o_ref[...] = jnp.zeros(o_ref.shape, o_ref.dtype)
    o_ref[0, :, pl.ds(Wp + 1, L)] = acc.astype(o_ref.dtype)


def _conv3x3_skip_kernel(y_ref, s_ref, w_ref, ws_ref, b_ref, mask_ref, o_ref,
                         *, H, Wp):
    """relu(conv3x3(y)*s2 + b2 + skip_1x1(s)*sd + bd)  — conv2 + BN2 + skip + ReLU.

    y_ref:  (1, Cmid, (H+3)*Wp)  conv2 input (padded-flat)
    s_ref:  (1, Cs,   (H+3)*Wp)  skip source (padded-flat, same spatial as y)
    w_ref:  (9, Cout, Cmid)      conv2 weight, BN2 scale folded
    ws_ref: (Cout, Cs)           1x1 skip weight (downsample BN scale folded)
    b_ref:  (Cout, 1)            combined bias (b2 [+ bd]) in f32
    """
    L = H * Wp
    # fused 1x1 skip conv on the valid region of the skip source
    acc = jnp.dot(ws_ref[...], s_ref[0, :, pl.ds(Wp + 1, L)],
                  preferred_element_type=jnp.float32)
    for k in range(9):
        dy, dx = divmod(k, 3)
        acc = acc + jnp.dot(w_ref[k], y_ref[0, :, pl.ds(dy * Wp + dx, L)],
                            preferred_element_type=jnp.float32)
    acc = jnp.maximum(acc + b_ref[...], 0.0) * mask_ref[...]
    o_ref[...] = jnp.zeros(o_ref.shape, o_ref.dtype)
    o_ref[0, :, pl.ds(Wp + 1, L)] = acc.astype(o_ref.dtype)


def _gemm_bias_relu_kernel(x_ref, w_ref, b_ref, o_ref):
    """relu(W @ patches + b)  — stride-2 conv1 via strided im2col GEMM."""
    acc = jnp.dot(w_ref[...], x_ref[0], preferred_element_type=jnp.float32)
    o_ref[0] = jnp.maximum(acc + b_ref[...], 0.0).astype(o_ref.dtype)


# --------------------------- layout / fold helpers -------------------------- #

def _pad_flat(x_nchw):
    """(N,C,H,W) -> (N,C,(H+3)*(W+2)) zero-padded, rows flattened on lanes.

    1 pad row on top, 2 at the bottom (the extra row gives the k=(2,2) shifted
    slice enough slack to stay in bounds), 1 pad column on each side.
    """
    N, C, H, W = x_nchw.shape
    xp = jnp.pad(x_nchw, ((0, 0), (0, 0), (1, 2), (1, 1)))
    return xp.reshape(N, C, (H + 3) * (W + 2))


def _valid_mask(H, W):
    Wp = W + 2
    cols = jnp.arange(H * Wp, dtype=jnp.int32) % Wp
    return (cols < W).astype(jnp.float32).reshape(1, H * Wp)


def _bn_fold(gamma, beta, mean, var, eps=1e-5):
    scale = gamma / jnp.sqrt(var + eps)
    return scale, beta - mean * scale


def _fold3x3(w_oihw, scale):
    """(Cout,Cin,3,3) * scale[o] -> (9, Cout, Cin) in bf16, k = dy*3+dx."""
    Cout, Cin = w_oihw.shape[:2]
    w = w_oihw * scale[:, None, None, None]
    return jnp.transpose(w, (2, 3, 0, 1)).reshape(9, Cout, Cin).astype(COMPUTE_DTYPE)


def _fold3x3_im2col(w_oihw, scale):
    """(Cout,Cin,3,3) * scale[o] -> (Cout, 9*Cin), col = (dy*3+dx)*Cin + c."""
    Cout, Cin = w_oihw.shape[:2]
    w = w_oihw * scale[:, None, None, None]
    return jnp.transpose(w, (0, 2, 3, 1)).reshape(Cout, 9 * Cin).astype(COMPUTE_DTYPE)


def _fold1x1(w_oi11, scale):
    return (w_oi11[:, :, 0, 0] * scale[:, None]).astype(COMPUTE_DTYPE)


def _strided_patches(x_nchw):
    """Stride-2 / pad-1 3x3 im2col (even positions only), channels-first.

    (N,C,H,W) -> (N, 9*C, (H//2)*(W//2)) in bf16.
    """
    N, C, H, W = x_nchw.shape
    Ho, Wo = H // 2, W // 2
    xp = jnp.pad(x_nchw, ((0, 0), (0, 0), (1, 1), (1, 1)))
    cols = [xp[:, :, dy:dy + H:2, dx:dx + W:2] for dy in range(3) for dx in range(3)]
    patches = jnp.concatenate(cols, axis=1)           # (N, 9*C, Ho, Wo)
    return patches.reshape(N, 9 * C, Ho * Wo).astype(COMPUTE_DTYPE)


# ------------------------------ conv wrappers ------------------------------- #

def conv3x3_bn_relu(x_pf, wfold, bias_vec, H, W):
    """Stride-1 3x3 conv + folded BN + ReLU, padded-flat in -> padded-flat out."""
    N, Cin, Lin = x_pf.shape
    Cout = wfold.shape[1]
    Wp = W + 2
    L = H * Wp
    Lout = (H + 3) * Wp
    assert Lin == Lout, (Lin, Lout)
    bias = bias_vec.reshape(Cout, 1).astype(jnp.float32)
    mask = _valid_mask(H, W)
    kernel = functools.partial(_conv3x3_kernel, H=H, Wp=Wp)
    return pl.pallas_call(
        kernel,
        out_shape=jax.ShapeDtypeStruct((N, Cout, Lout), COMPUTE_DTYPE),
        grid_spec=pltpu.PrefetchScalarGridSpec(
            num_scalar_prefetch=0,
            grid=(N,),
            in_specs=[
                pl.BlockSpec((1, Cin, Lin), lambda n: (n, 0, 0)),
                pl.BlockSpec((9, Cout, Cin), lambda n: (0, 0, 0)),
                pl.BlockSpec((Cout, 1), lambda n: (0, 0)),
                pl.BlockSpec((1, L), lambda n: (0, 0)),
            ],
            out_specs=pl.BlockSpec((1, Cout, Lout), lambda n: (n, 0, 0)),
        ),
        compiler_params=_compiler_params(),
    )(x_pf, wfold, bias, mask)


def conv3x3_skip_bn_add_relu(y_pf, s_pf, wfold, wskip, bias_vec, H, W):
    """conv2(3x3) + BN2 + fused 1x1 skip conv + add + ReLU, padded-flat layout."""
    N, Cmid, Lin = y_pf.shape
    _, Cs, Ls = s_pf.shape
    Cout = wfold.shape[1]
    Wp = W + 2
    L = H * Wp
    Lout = (H + 3) * Wp
    assert Lin == Lout and Ls == Lout, (Lin, Ls, Lout)
    bias = bias_vec.reshape(Cout, 1).astype(jnp.float32)
    mask = _valid_mask(H, W)
    kernel = functools.partial(_conv3x3_skip_kernel, H=H, Wp=Wp)
    return pl.pallas_call(
        kernel,
        out_shape=jax.ShapeDtypeStruct((N, Cout, Lout), COMPUTE_DTYPE),
        grid_spec=pltpu.PrefetchScalarGridSpec(
            num_scalar_prefetch=0,
            grid=(N,),
            in_specs=[
                pl.BlockSpec((1, Cmid, Lin), lambda n: (n, 0, 0)),
                pl.BlockSpec((1, Cs, Ls), lambda n: (n, 0, 0)),
                pl.BlockSpec((9, Cout, Cmid), lambda n: (0, 0, 0)),
                pl.BlockSpec((Cout, Cs), lambda n: (0, 0)),
                pl.BlockSpec((Cout, 1), lambda n: (0, 0)),
                pl.BlockSpec((1, L), lambda n: (0, 0)),
            ],
            out_specs=pl.BlockSpec((1, Cout, Lout), lambda n: (n, 0, 0)),
        ),
        compiler_params=_compiler_params(),
    )(y_pf, s_pf, wfold, wskip, bias, mask)


def conv3x3_s2_bn_relu(x_nchw, w_oihw, scale, bias_vec):
    """Stride-2 3x3 conv + folded BN + ReLU via strided im2col GEMM.

    Returns the result in padded-flat layout ready for the following conv.
    """
    N, Cin, H, W = x_nchw.shape
    Cout = w_oihw.shape[0]
    Ho, Wo = H // 2, W // 2
    M = Ho * Wo
    patches = _strided_patches(x_nchw)                 # (N, 9*Cin, M)
    wmat = _fold3x3_im2col(w_oihw, scale)              # (Cout, 9*Cin)
    bias = bias_vec.reshape(Cout, 1).astype(jnp.float32)
    y = pl.pallas_call(
        _gemm_bias_relu_kernel,
        out_shape=jax.ShapeDtypeStruct((N, Cout, M), COMPUTE_DTYPE),
        grid_spec=pltpu.PrefetchScalarGridSpec(
            num_scalar_prefetch=0,
            grid=(N,),
            in_specs=[
                pl.BlockSpec((1, 9 * Cin, M), lambda n: (n, 0, 0)),
                pl.BlockSpec((Cout, 9 * Cin), lambda n: (0, 0)),
                pl.BlockSpec((Cout, 1), lambda n: (0, 0)),
            ],
            out_specs=pl.BlockSpec((1, Cout, M), lambda n: (n, 0, 0)),
        ),
        compiler_params=_compiler_params(),
    )(patches, wmat, bias)
    y_pf = _pad_flat(y.reshape(N, Cout, Ho, Wo))       # small tensor, cheap pad
    return y_pf, Ho, Wo


# ------------------------- ResidualUnit / Block ----------------------------- #

def residual_unit_downsample(x_nchw, p):
    """First (downsampling) unit: stride-2 conv1, 1x1 stride-2 conv + BN skip."""
    s1, b1 = _bn_fold(*p["bn1"])
    y_pf, Ho, Wo = conv3x3_s2_bn_relu(x_nchw, p["conv1_w"], s1, b1)

    # stride-2 skip source at the output resolution, padded-flat
    xs_pf = _pad_flat(x_nchw[:, :, ::2, ::2]).astype(COMPUTE_DTYPE)

    s2, b2 = _bn_fold(*p["bn2"])
    sd, bd = _bn_fold(*p["ds_bn"])
    w2 = _fold3x3(p["conv2_w"], s2)
    wsk = _fold1x1(p["ds_conv_w"], sd)
    out_pf = conv3x3_skip_bn_add_relu(y_pf, xs_pf, w2, wsk, b2 + bd, Ho, Wo)
    return out_pf, Ho, Wo


def residual_unit_plain(x_pf, H, W, p):
    """Non-downsampling unit: stride-1 convs, 1x1 identity-channels conv skip."""
    cout = p["conv1_w"].shape[0]
    s1, b1 = _bn_fold(*p["bn1"])
    w1 = _fold3x3(p["conv1_w"], s1)
    y_pf = conv3x3_bn_relu(x_pf, w1, b1, H, W)

    s2, b2 = _bn_fold(*p["bn2"])
    w2 = _fold3x3(p["conv2_w"], s2)
    wid = _fold1x1(p["id_conv_w"], jnp.ones((cout,), jnp.float32))  # no BN on skip
    out_pf = conv3x3_skip_bn_add_relu(y_pf, x_pf, w2, wid, b2, H, W)
    return out_pf


def residual_block_forward(x_nchw, params):
    out_pf, H, W = residual_unit_downsample(x_nchw, params[0])
    for p in params[1:]:
        out_pf = residual_unit_plain(out_pf, H, W, p)
    N, Cout, _ = out_pf.shape
    out = out_pf.reshape(N, Cout, H + 3, W + 2)[:, :, 1:1 + H, 1:1 + W]
    return out.astype(jnp.float32)   # already NCHW


# --------------------------- deterministic init ----------------------------- #

def _init_bn(key, c):
    k1, k2, k3, k4 = jax.random.split(key, 4)
    gamma = 1.0 + 0.1 * jax.random.normal(k1, (c,), jnp.float32)
    beta = 0.1 * jax.random.normal(k2, (c,), jnp.float32)
    running_mean = 0.1 * jax.random.normal(k3, (c,), jnp.float32)
    running_var = 1.0 + 0.1 * jax.random.uniform(k4, (c,), jnp.float32)
    return gamma, beta, running_mean, running_var


def _init_residual_unit(key, n_in, n_out, downsample):
    ks = jax.random.split(key, 6)
    w = lambda k, shape: 0.1 * jax.random.normal(k, shape, jnp.float32)
    p = {"downsample": downsample}
    p["conv1_w"] = w(ks[0], (n_out, n_in, 3, 3))
    p["bn1"] = _init_bn(ks[1], n_out)
    p["conv2_w"] = w(ks[2], (n_out, n_out, 3, 3))
    p["bn2"] = _init_bn(ks[3], n_out)
    if downsample:
        p["ds_conv_w"] = w(ks[4], (n_out, n_in, 1, 1))
        p["ds_bn"] = _init_bn(ks[5], n_out)
    else:
        p["id_conv_w"] = w(ks[4], (n_out, n_in, 1, 1))
    return p


def init_residual_block(key, n_input, n_output, n_res_units):
    if n_res_units == 3:
        inputs = [n_input, n_output // 4, n_output // 4]
        outputs = [n_output // 4, n_output // 4, n_output]
    else:
        inputs = [n_input, n_output // 4, n_output // 4,
                  n_output // 4, n_output // 4, n_output]
        outputs = [n_output // 4, n_output // 4, n_output // 4,
                   n_output // 4, n_output, n_output]
    keys = jax.random.split(key, n_res_units)
    return [
        _init_residual_unit(keys[i], inputs[i], outputs[i], downsample=(i == 0))
        for i in range(n_res_units)
    ]


# ----------------------------------- main ----------------------------------- #

if __name__ == "__main__":
    key = jax.random.PRNGKey(0)
    kx, kp = jax.random.split(key)

    # Shapes consistent with ResidualBlock(n_input=8, n_output=16, n_res_units=3)
    N, C_in, H, W = 2, 8, 16, 16
    n_output, n_res_units = 16, 3

    x = jax.random.normal(kx, (N, C_in, H, W), jnp.float32)  # NCHW, like PyTorch
    params = init_residual_block(kp, C_in, n_output, n_res_units)

    out = residual_block_forward(x, params)
    out = jax.block_until_ready(out)

    # First unit downsamples by 2, output channels = n_output
    assert out.shape == (N, n_output, H // 2, W // 2), out.shape
    assert bool(jnp.all(jnp.isfinite(out)))
    print("KERNEL_OK")
</pallas_src>

<mosaic_0001>
module attributes {stable_mosaic.version = 11 : i64} {
  func.func @_gemm_bias_relu_kernel(%arg0: i32, %arg1: memref<1x72x64xbf16, #tpu.memory_space<vmem>>, %arg2: memref<4x72xbf16, #tpu.memory_space<vmem>>, %arg3: memref<4x1xf32, #tpu.memory_space<vmem>>, %arg4: memref<1x4x64xbf16, #tpu.memory_space<vmem>>) attributes {dimension_semantics = [#tpu.dimension_semantics<parallel>], iteration_bounds = array<i64: 2>, scalar_prefetch = 0 : i64, scratch_operands = 0 : i64, tpu.core_type = #tpu.core_type<tc>, window_params = [{transform_indices = @transform_0, window_bounds = array<i64: 1, 72, 64>}, {pipeline_mode = #tpu.pipeline_mode<synchronous>, transform_indices = @transform_1, window_bounds = array<i64: 4, 72>}, {pipeline_mode = #tpu.pipeline_mode<synchronous>, transform_indices = @transform_2, window_bounds = array<i64: 4, 1>}, {transform_indices = @transform_3, window_bounds = array<i64: 1, 4, 64>}]} {
    %c0 = arith.constant 0 : index
    %c0_0 = arith.constant 0 : index
    %0 = vector.load %arg2[%c0, %c0_0] : memref<4x72xbf16, #tpu.memory_space<vmem>>, vector<4x72xbf16>
    %c0_1 = arith.constant 0 : index
    %c0_2 = arith.constant 0 : index
    %c0_3 = arith.constant 0 : index
    %1 = vector.load %arg1[%c0_1, %c0_2, %c0_3] : memref<1x72x64xbf16, #tpu.memory_space<vmem>>, vector<1x72x64xbf16>
    %2 = vector.shape_cast %1 : vector<1x72x64xbf16> to vector<72x64xbf16>
    %cst = arith.constant dense<0.000000e+00> : vector<4x64xf32>
    %3 = tpu.matmul %0, %2, %cst {dimension_numbers = #tpu.dot_dimension_numbers<[1], [0], [0], [1], [0, 0, 1, 1], [], []>} : vector<4x72xbf16>, vector<72x64xbf16>, vector<4x64xf32> -> vector<4x64xf32>
    %c0_4 = arith.constant 0 : index
    %c0_5 = arith.constant 0 : index
    %4 = vector.load %arg3[%c0_4, %c0_5] : memref<4x1xf32, #tpu.memory_space<vmem>>, vector<4x1xf32>
    %5 = vector.broadcast %4 : vector<4x1xf32> to vector<4x64xf32>
    %6 = arith.addf %3, %5 : vector<4x64xf32>
    %cst_6 = arith.constant 0.000000e+00 : f32
    %7 = vector.broadcast %cst_6 : f32 to vector<4x64xf32>
    %8 = arith.maximumf %6, %7 : vector<4x64xf32>
    %9 = arith.truncf %8 : vector<4x64xf32> to vector<4x64xbf16>
    %c0_7 = arith.constant 0 : index
    %c0_8 = arith.constant 0 : index
    %c0_9 = arith.constant 0 : index
    %10 = vector.load %arg4[%c0_7, %c0_8, %c0_9] : memref<1x4x64xbf16, #tpu.memory_space<vmem>>, vector<1x4x64xbf16>
    %11 = vector.shape_cast %10 : vector<1x4x64xbf16> to vector<4x64xbf16>
    %12 = vector.shape_cast %9 : vector<4x64xbf16> to vector<1x4x64xbf16>
    tpu.vector_store %arg4[%c0_7, %c0_8, %c0_9], %12 {strides = array<i32>} : memref<1x4x64xbf16, #tpu.memory_space<vmem>>, vector<1x4x64xbf16>,
    return
  }
  func.func @transform_0(%arg0: i32) -> (i32, i32, i32) {
    %c0_i32 = arith.constant 0 : i32
    %c0_i32_0 = arith.constant 0 : i32
    %c0_i32_1 = arith.constant 0 : i32
    return %arg0, %c0_i32, %c0_i32_0 : i32, i32, i32
  }
  func.func @transform_1(%arg0: i32) -> (i32, i32) {
    %c0_i32 = arith.constant 0 : i32
    %c0_i32_0 = arith.constant 0 : i32
    %c0_i32_1 = arith.constant 0 : i32
    return %c0_i32, %c0_i32_0 : i32, i32
  }
  func.func @transform_2(%arg0: i32) -> (i32, i32) {
    %c0_i32 = arith.constant 0 : i32
    %c0_i32_0 = arith.constant 0 : i32
    %c0_i32_1 = arith.constant 0 : i32
    return %c0_i32, %c0_i32_0 : i32, i32
  }
  func.func @transform_3(%arg0: i32) -> (i32, i32, i32) {
    %c0_i32 = arith.constant 0 : i32
    %c0_i32_0 = arith.constant 0 : i32
    %c0_i32_1 = arith.constant 0 : i32
    return %arg0, %c0_i32, %c0_i32_0 : i32, i32, i32
  }
}

</mosaic_0001>

<bundles_post_ra>
// kernel: tpu_custom_call.1
= control target key start
LH: loop header
LB: loop body
LE: loop exit
PB: predicated region body
PF: predicated region fallthrough
CT: control target
= control target key end

     0   :  { %8 = vsyncpa [#allocation3], 0  ;;  %s617_s0 = inlined_call_operand.vmem [shape: bf16[2,72,64], index: 0, kind: input, shape index: {}]   ;;  %s618_s1 = inlined_call_operand.vmem [shape: bf16[4,72], index: 1, kind: input, shape index: {}]   ;;  %s619_s2 = inlined_call_operand.vmem [shape: f32[4,1], index: 2, kind: input, shape index: {}]   ;;  %s620_s3 = inlined_call_operand.hbm [shape: bf16[2,4,64], index: 3, kind: output, shape index: {}]  }
   0x1   :  { %10 = vsyncpa [#allocation3 + $0x1], 0  ;;  %s511_s12 = smov 0   ;;  %s513_s13 = smov 0  }
   0x2   :  { %s515_s14 = smov 0   ;;  %s517_s15 = smov 0  }
   0x3 LB: > { %s532_s16 = sadd.s32 4294967295, %s485_s15   ;;  %s338_s17 = sadd.s32 4294967294, %s485_s15   ;;  %s485_s15 = sphi %s517_s15, %s626_s15   ;;  %s481_s14 = sphi %s515_s14, %s625_s14   ;;  %s477_s13 = sphi %s513_s13, %s624_s13   ;;  %s473_s12 = sphi %s511_s12, %s623_s12  }
   0x4   : > { %s536_s18 = sadd.s32 1, %s485_s15   ;;  %s91_s19 = sadd.s32 1, %s481_s14 }
   0x5   : > { %s88_s20 = ssub.s32 %s485_s15, %s536_s18  ;;  %p101_p0 = scmp.ne.s32.totalorder %s481_s14, %s477_s13 }
   0x6   : > { %p89_p1 = scmp.eq.s32.totalorder %s88_s20, 0  ;;  %p102_p2 = scmp.eq.s32.totalorder %s532_s16, 1 }
   0x7   : > { %p107_p3 = scmp.ne.s32.totalorder %s477_s13, %s473_s12  ;;  %p108_p4 = scmp.eq.s32.totalorder %s338_s17, 1 }
   0x8   : > { %s547_s21 = scalar_select %p89_p1, %s481_s14, %s91_s19  }
   0x9   : > { %p549_p5 = por %p102_p2, %p101_p0  ;;  %p553_p6 = por %p108_p4, %p107_p3 }
   0xa   : > { %p341_p7 = scmp.ge.s32.totalorder %s485_s15, 1  ;;  %p140_p8 = scmp.lt.s32.totalorder %s485_s15, 3 }
   0xc   : > { %p141_p9 = pnand %p341_p7, %p140_p8 }
   0xd   : > { %p164_p10 = scmp.lt.s32.totalorder (!%p141_p9), %s532_s16, 1  ;;  %v487_v0 = vmov (!%p141_p9), 0.0   ;;  %vm488_vm0 = vmmov (!%p141_p9), 0   ;;  %v180_v1 = vld [vmem:[%s619_s2] sm:$0xf] (!%p141_p9)  ;;  %v489_v2 = vmov (!%p141_p9), 0  }
   0xe   : > { %144 = sbr.rel (%p141_p9) target bundleno = 278 (0x116), region = 32  ;;  %360 = vmatprep.subr.bf16.mxu0 (!%p141_p9), %v487_v0  ;;  %370 = vmatprep.mubr.msk.bf16.mxu0 (!%p141_p9), %vm488_vm0, %v487_v0  ;;  %vm217_vm1 = vcmask (!%p141_p9), 1043456   ;;  %v170_v9 = vld [vmem:[%s618_s1] sm:$0x3] (!%p141_p9)  ;;  %vm213_vm2 = vcmask (!%p141_p9), 588800   ;;  %s161_s6 = sand.u32 (!%p141_p9), 1, %s477_s13  }
   0xf   : > { %417 = vset.pattern.permute.xlu0 (!%p141_p9), %v489_v2  ;;  %s342_s7 = sshll.u32 (!%p141_p9), %s161_s6, 1  ;;  %s351_s8 = sshll.u32 (!%p141_p9), %s532_s16, 5  ;;  %vm263_vm3 = vcmask (!%p141_p9), 517120  }
  0x10   : > { %183 = vperm.xlu0 (!%p141_p9), %417, %v180_v1   ;;  %s163_s9 = scalar_lea.vmem (!%p141_p9), [#allocation2], %s342_s7  ;;  %s575_s19 = scalar_lea.hbm (!%p141_p9), %s620_s3, %s351_s8 }
  0x11   : > { %s279_s10 = sshll.u32 (!%p141_p9), %s163_s9, 4  ;;  %s266_s20 = scalar_lea.sflag (!%p141_p9), [#allocation3], %s161_s6  ;;  %s577_s10 = int_to_ptr.vmem [resolvable:$true] %s279_s10 }
  0x12   : > { %s423_s24 = scalar_lea.vmem (!%p141_p9), %s577_s10, 32 }
  0x13   : > { %p424_p11 = scmp.ne.s32.totalorder (!%p141_p9), %s577_s10, %s423_s24 }
  0x15   : > { %s165_s26 = scalar_select %p164_p10, %s532_s16, 1 }
  0x16   : > { %p425_p12 = pnand %p424_p11, %p549_p5  ;;  %s490_s16 = smov [#allocation2]  }
  0x17   : > { %s374_s27 = smul.u32 36, %s165_s26  ;;  %s427_s25 = sshll.u32 %s490_s16, 4  ;;  %s428_s25 = int_to_ptr.vmem [resolvable:$false] %s427_s25 }
  0x18   : > { %p426_p13 = pneg %p425_p12  ;;  %s429_s26 = scalar_lea.vmem %s428_s25, 64 }
  0x19   : > { %s168_s30 = scalar_lea.vmem %s617_s0, %s374_s27  ;;  %p430_p0 = scmp.lt.s32.totalorder %s577_s10, %s428_s25 }
  0x1a   : > { %v418_v3 = vld [vmem:[%s168_s30] sm:$0xff]   ;;  %v419_v4 = vld [vmem:[%s168_s30 + $0x8] sm:$0xff]   ;;  %v420_v5 = vld [vmem:[%s168_s30 + $0x10] sm:$0xff]   ;;  %p431_p1 = scmp.lt.s32.totalorder %s429_s26, %s423_s24 }
  0x1b   : > { %361 = vmatpush3.bf16.msra.mxu0 %v418_v3  ;;  %v421_v6 = vld [vmem:[%s168_s30 + $0x18] sm:$0xff]   ;;  %v422_v7 = vld [vmem:[%s168_s30 + $0x20] ss:$0 sps:$4 sm:$0xff]  }
  0x1c   : > { %362 = vmatprep.subr.bf16.mxu0 %v487_v0  ;;  %v219_v8 = vsel %vm217_vm1, %v422_v7, 0  ;;  %p432_p2 = por %p431_p1, %p430_p0 }
  0x1e   : > { %p433_p3 = pnand %p432_p2, %p426_p13 }
  0x1f   : > { %363 = vmatpush3.bf16.msra.mxu0 %v419_v4 }
  0x20   : > { %364 = vmatprep.subr.bf16.mxu0 %v487_v0 }
  0x23   : > { %365 = vmatpush3.bf16.msra.mxu0 %v420_v5 }
  0x24   : > { %366 = vmatprep.subr.bf16.mxu0 %v487_v0 }
  0x27   : > { %367 = vmatpush3.bf16.msra.mxu0 %v421_v6 }
  0x28   : > { %368 = vmatprep.subr.bf16.mxu0 %v487_v0 }
  0x2b   : > { %369 = vmatpush3.bf16.msra.mxu0 %v219_v8 }
  0x2e   : > { %371 = vmatmul.mubr.msk.bf16.vlgmr.msra.gmra.mrb[0].mxu0 %vm213_vm2, %v170_v9 }
  0x8f   : > { %v184_v10 = vpop.permute.xlu0 %183 }
 0x101   : > { %v255_v11 = vpop.f32.mrb[0].mxu0 }
 0x102   : > { %v256_v12 = vadd.f32 %v255_v11, %v184_v10  ;;  %v372_v13 = vpop.f32.mrb[1].mxu0 }
 0x103   : > { %v258_v14 = vpop.f32.mrb[2].mxu0 }
 0x104   : > { %v261_v15 = vmax.f32 %v256_v12, 0.0  ;;  %v373_v16 = vpop.f32.mrb[3].mxu0 }
 0x106   : > { %v262_v17 = vpack.c.bf16 %v261_v15, %v261_v15 }
 0x108   : > { %264 = vst.msk [vmem:[%s163_s9] sm:$0x3] %vm263_vm3, %v262_v17 }
 0x109   : > { %436 = shalt.err (!%p433_p3)
}
 0x10a   : > { %s437_s27 = scalar_lea.hbm %s575_s19, 32  ;;  %s441_s30 = scalar_lea.hbm %s620_s3, 64 }
 0x10b   : > { %p438_p4 = scmp.ne.s32.totalorder %s575_s19, %s437_s27  ;;  %p442_p9 = scmp.lt.u32.totalorder %s575_s19, %s620_s3 }
 0x10c   : > { %p443_p10 = scmp.lt.u32.totalorder %s441_s30, %s437_s27  ;;  %p445_p12 = scmp.lt.u32.totalorder %s437_s27, %s575_s19 }
 0x10d   : > { %p439_p7 = pnand %p438_p4, %p549_p5 }
 0x10e   : > { %p444_p11 = por %p443_p10, %p442_p9 }
 0x10f   : > { %p440_p8 = pneg %p439_p7 }
 0x110   : > { %p446_p13 = por %p445_p12, %p444_p11 }
 0x112   : > { %p447_p0 = pnand %p446_p13, %p440_p8 }
 0x114   : > { %450 = shalt.err (!%p447_p0)
}
 0x115   : > { %375 = dma.vmem_to_hbm [thread:$0]  (%p549_p5), %s577_s10, 32, %s575_s19, %s266_s20  }
 0x116 PF: > { %p381_p1 = scmp.ge.s32.totalorder %s485_s15, 2  ;;  %s291_s6 = sand.u32 1, %s473_s12  }
 0x117   : > { %s292_s7 = scalar_lea.sflag [#allocation3], %s291_s6 }
 0x118   : > { %p378_p2 = pnand %p381_p1, %p553_p6 }
 0x11a   : > { %468 = dma.done.wait (!%p378_p2), %s292_s7, 32  }
 0x11b   : > { %470 = vsyncadd (!%p378_p2), %s292_s7, 4294967264  ;;  %p13_p3 = scmp.ge.s32.totalorder %s536_s18, 4   ;;  %s623_s12 = smov %s477_s13 }
 0x11c   : > { %s624_s13 = smov %s481_s14  ;;  %s625_s14 = smov %s547_s21 }
 0x11d   : > { %s626_s15 = smov %s536_s18  ;;  %15 = sbr.rel (!%p13_p3) target bundleno = 3 (0x3), region = 67 }
 0x124   :  { %297 = vsyncpa [#allocation3], 1 }
 0x125   :  { %299 = vsyncpa [#allocation3 + $0x1], 1 }

</bundles_post_ra>
